<compile_context>
chip_gen: v5e
topology: v5e:2x2
jax: 0.10.0
libtpu: 0.0.40
codegen_flags: <defaults>
</compile_context>

<pallas_src>
import functools

import jax
import jax.numpy as jnp
from jax.experimental import pallas as pl
from jax.experimental.pallas import tpu as pltpu


def _cdiv(a: int, b: int) -> int:
    return -(-a // b)


def _vmem_limit_bytes() -> int:
    """Generation-aware VMEM budget: ~3/4 of physical, capped at 100 MiB.
    Falls back to a v7x-safe 64 MiB physical assumption if the query fails."""
    cap = 64 * 1024 * 1024
    try:
        cap = int(pltpu.get_tpu_info().vmem_capacity_bytes)
    except Exception:
        pass
    return max(32 * 1024 * 1024, min((cap * 3) // 4, 100 * 1024 * 1024))


# --------------------------- fast path (resident) ---------------------------

def _fused_bn_kernel(x_ref, w_ref, b_ref, o_ref, *, eps: float, n_rows: int):
    """Whole x resident in VMEM: stats + apply in one pass (1R + 1W of x)."""
    x = x_ref[...].astype(jnp.float32)                       # [N, d]
    inv_n = jnp.float32(1.0 / n_rows)
    s = jnp.sum(x, axis=0, keepdims=True)
    q = jnp.sum(x * x, axis=0, keepdims=True)
    mean = s * inv_n
    var = jnp.maximum(q * inv_n - mean * mean, 0.0)          # biased (training) var
    inv_std = jax.lax.rsqrt(var + jnp.float32(eps))
    scale = inv_std * w_ref[...].astype(jnp.float32)
    shift = b_ref[...].astype(jnp.float32) - mean * scale
    o_ref[...] = (x * scale + shift).astype(o_ref.dtype)


# --------------------------- tiled path (streaming) -------------------------

def _stats_kernel(x_ref, psum_ref, psq_ref, *, tile_n: int, p_rows: int,
                  rows: int, rem: int):
    """Per-block partial sum / sumsq.  Reduces only to (p_rows, tile_c) so the
    cross-sublane collapse happens once, in the tiny JAX epilogue."""
    x = x_ref[...].astype(jnp.float32)                       # [tile_n, tile_c]
    if rem != 0:
        # Tail row tile: out-of-bounds rows hold garbage -> zero them so they
        # do not pollute the per-channel sums (true count N is used later).
        t = pl.program_id(0)
        row_ids = t * tile_n + jax.lax.broadcasted_iota(jnp.int32, x.shape, 0)
        x = jnp.where(row_ids < rows, x, 0.0)
    xr = x.reshape(tile_n // p_rows, p_rows, x.shape[-1])
    psum_ref[...] = jnp.sum(xr, axis=0)
    psq_ref[...] = jnp.sum(xr * xr, axis=0)


def _apply_kernel(x_ref, scale_ref, shift_ref, o_ref):
    """y = x * scale + shift (affine already folded into scale/shift)."""
    x = x_ref[...].astype(jnp.float32)
    o_ref[...] = (x * scale_ref[...] + shift_ref[...]).astype(o_ref.dtype)


# --------------------------------- wrapper ----------------------------------

def ttm_batchnorm(x: jax.Array, weight: jax.Array, bias: jax.Array,
                  eps: float = 1e-5, *, tile_rows: int | None = None,
                  tile_chans: int | None = None,
                  force_tiled: bool = False) -> jax.Array:
    """x: [B, sl, d_model]; weight/bias: [d_model]. Returns [B, sl, d_model]."""
    B, sl, d = x.shape
    N = B * sl
    dtype = x.dtype
    itemsize = jnp.dtype(dtype).itemsize
    vmem_limit = _vmem_limit_bytes()

    x2 = x.reshape(N, d)
    w2 = weight.reshape(1, d)
    b2 = bias.reshape(1, d)

    # -------- fast path: whole tensor VMEM-resident, single fused kernel ----
    # per-element budget: x in + y out + f32 working copy + one f32 temp,
    # plus 25% headroom and 1 MiB slack for compiler internal scratch.
    fast_need = N * d * (2 * itemsize + 8) * 5 // 4 + (1 << 20)
    if (not force_tiled) and fast_need <= vmem_limit:
        out = pl.pallas_call(
            functools.partial(_fused_bn_kernel, eps=float(eps), n_rows=N),
            out_shape=jax.ShapeDtypeStruct((N, d), dtype),
            in_specs=[pl.BlockSpec(memory_space=pltpu.MemorySpace.VMEM)] * 3,
            out_specs=pl.BlockSpec(memory_space=pltpu.MemorySpace.VMEM),
            compiler_params=pltpu.CompilerParams(vmem_limit_bytes=vmem_limit),
            cost_estimate=pl.CostEstimate(
                flops=5 * N * d, transcendentals=d,
                bytes_accessed=2 * N * d * itemsize + 2 * d * 4),
        )(x2, w2, b2)
        return out.reshape(B, sl, d)

    # -------- tiled two-pass path --------------------------------------------
    # Lane packing: fold `pack` consecutive rows into the lane dim so blocks
    # are 128-lane dense when d_model is narrow (e.g. d=32 -> pack=4).
    pack = 1
    if d < 128 and 128 % d == 0 and N % (128 // d) == 0:
        pack = 128 // d
    rows = N // pack
    chans = d * pack
    x2p = x2.reshape(rows, chans)          # free row-major reshape

    # Channel tile: full extent when modest (always legal), else 512 lanes.
    if tile_chans is not None:
        tile_c = int(tile_chans)
    elif chans <= 1024:
        tile_c = chans
    else:
        tile_c = 512
    n_ct = _cdiv(chans, tile_c)

    # Row tile from the generation-aware VMEM budget:
    #   apply pass holds x-block + y-block, double-buffered -> ~4 blocks live.
    block_budget = vmem_limit // 6
    tn = block_budget // max(1, tile_c * itemsize)
    if tile_rows is not None:
        tn = int(tile_rows)
    tn = max(8, (min(tn, 8192) // 8) * 8)
    if rows >= 8:
        tile_n = min(tn, (rows // 8) * 8)        # multiple of 8, <= rows
    else:
        tile_n = rows                            # full extent (legal)
    n_rt = _cdiv(rows, tile_n)
    rem = rows % tile_n
    p_rows = 8 if tile_n % 8 == 0 else 1

    # ----- pass 1: per-(row-tile) partial sums, fully parallel grid ----------
    psum, psq = pl.pallas_call(
        functools.partial(_stats_kernel, tile_n=tile_n, p_rows=p_rows,
                          rows=rows, rem=rem),
        out_shape=(jax.ShapeDtypeStruct((n_rt * p_rows, chans), jnp.float32),
                   jax.ShapeDtypeStruct((n_rt * p_rows, chans), jnp.float32)),
        grid=(n_rt, n_ct),
        in_specs=[pl.BlockSpec((tile_n, tile_c), lambda t, c: (t, c))],
        out_specs=(pl.BlockSpec((p_rows, tile_c), lambda t, c: (t, c)),
                   pl.BlockSpec((p_rows, tile_c), lambda t, c: (t, c))),
        compiler_params=pltpu.CompilerParams(
            dimension_semantics=("parallel", "parallel"),
            vmem_limit_bytes=vmem_limit),
        cost_estimate=pl.CostEstimate(
            flops=3 * rows * chans, transcendentals=0,
            bytes_accessed=rows * chans * itemsize
                           + 2 * n_rt * p_rows * chans * 4),
    )(x2p)

    # ----- tiny epilogue (a few hundred floats): stats -> scale/shift --------
    s = jnp.sum(psum, axis=0)
    q = jnp.sum(psq, axis=0)
    if pack > 1:
        s = jnp.sum(s.reshape(pack, d), axis=0)
        q = jnp.sum(q.reshape(pack, d), axis=0)
    inv_n = jnp.float32(1.0 / N)
    mean = s * inv_n
    var = jnp.maximum(q * inv_n - mean * mean, 0.0)
    inv_std = jax.lax.rsqrt(var + jnp.float32(eps))
    scale = inv_std * weight.astype(jnp.float32)
    shift = bias.astype(jnp.float32) - mean * scale
    if pack > 1:                                  # replicate across lane groups
        scale = jnp.tile(scale, pack)
        shift = jnp.tile(shift, pack)
    scale2 = scale.reshape(1, chans)
    shift2 = shift.reshape(1, chans)

    # ----- pass 2: y = x * scale + shift --------------------------------------
    out2 = pl.pallas_call(
        _apply_kernel,
        out_shape=jax.ShapeDtypeStruct((rows, chans), dtype),
        grid=(n_rt, n_ct),
        in_specs=[pl.BlockSpec((tile_n, tile_c), lambda t, c: (t, c)),
                  pl.BlockSpec((1, tile_c), lambda t, c: (0, c)),
                  pl.BlockSpec((1, tile_c), lambda t, c: (0, c))],
        out_specs=pl.BlockSpec((tile_n, tile_c), lambda t, c: (t, c)),
        compiler_params=pltpu.CompilerParams(
            dimension_semantics=("parallel", "parallel"),
            vmem_limit_bytes=vmem_limit),
        cost_estimate=pl.CostEstimate(
            flops=2 * rows * chans, transcendentals=0,
            bytes_accessed=2 * rows * chans * itemsize + 2 * chans * 4),
    )(x2p, scale2, shift2)

    return out2.reshape(B, sl, d)


# --------------------------------- test -------------------------------------

def _reference(x, weight, bias, eps):
    B, sl, d = x.shape
    xr = x.reshape(B * sl, d).astype(jnp.float32)
    mean = xr.mean(axis=0, keepdims=True)
    var = ((xr - mean) ** 2).mean(axis=0, keepdims=True)
    y = (xr - mean) / jnp.sqrt(var + eps) * weight + bias
    return y.reshape(B, sl, d).astype(x.dtype)


if __name__ == "__main__":
    norm_eps = 1e-5
    key = jax.random.PRNGKey(0)
    k1, k2, k3, k4 = jax.random.split(key, 4)

    # Small shape implied by the module: [B, sl, d_model]
    B, sl, d_model = 2, 8, 32
    x = jax.random.normal(k1, (B, sl, d_model), dtype=jnp.float32)
    weight = 1.0 + 0.1 * jax.random.normal(k2, (d_model,), dtype=jnp.float32)
    bias = 0.05 * jax.random.normal(k3, (d_model,), dtype=jnp.float32)

    out = jax.block_until_ready(ttm_batchnorm(x, weight, bias, eps=norm_eps))
    ref = _reference(x, weight, bias, norm_eps)
    assert out.shape == (B, sl, d_model)
    err = float(jnp.max(jnp.abs(out - ref)))
    assert jnp.allclose(out, ref, atol=1e-4, rtol=1e-4), f"fast path mismatch: {err}"

    # Also exercise the tiled (large-input) path at a small, uneven row count so
    # the cdiv tail masking and lane-packing paths are covered.
    B2, sl2 = 2, 100
    x_big = jax.random.normal(k4, (B2, sl2, d_model), dtype=jnp.float32)
    out2 = jax.block_until_ready(
        ttm_batchnorm(x_big, weight, bias, eps=norm_eps,
                      force_tiled=True, tile_rows=16))
    ref2 = _reference(x_big, weight, bias, norm_eps)
    err2 = float(jnp.max(jnp.abs(out2 - ref2)))
    assert jnp.allclose(out2, ref2, atol=1e-4, rtol=1e-4), f"tiled path mismatch: {err2}"

    print("KERNEL_OK")
</pallas_src>

<mosaic_0001>
module attributes {stable_mosaic.version = 11 : i64} {
  func.func @_fused_bn_kernel(%arg0: memref<16x32xf32, #tpu.memory_space<vmem>>, %arg1: memref<1x32xf32, #tpu.memory_space<vmem>>, %arg2: memref<1x32xf32, #tpu.memory_space<vmem>>, %arg3: memref<16x32xf32, #tpu.memory_space<vmem>>) attributes {dimension_semantics = [], scalar_prefetch = 0 : i64, scratch_operands = 0 : i64, tpu.core_type = #tpu.core_type<tc>} {
    %c0 = arith.constant 0 : index
    %c0_0 = arith.constant 0 : index
    %0 = vector.load %arg0[%c0, %c0_0] : memref<16x32xf32, #tpu.memory_space<vmem>>, vector<16x32xf32>
    %cst = arith.constant dense<0.000000e+00> : vector<32xf32>
    %1 = vector.multi_reduction <add>, %0, %cst [0] : vector<16x32xf32> to vector<32xf32>
    %2 = vector.shape_cast %1 : vector<32xf32> to vector<1x32xf32>
    %3 = arith.mulf %0, %0 : vector<16x32xf32>
    %cst_1 = arith.constant dense<0.000000e+00> : vector<32xf32>
    %4 = vector.multi_reduction <add>, %3, %cst_1 [0] : vector<16x32xf32> to vector<32xf32>
    %5 = vector.shape_cast %4 : vector<32xf32> to vector<1x32xf32>
    %cst_2 = arith.constant 6.250000e-02 : f32
    %6 = vector.broadcast %cst_2 : f32 to vector<1x32xf32>
    %7 = arith.mulf %2, %6 : vector<1x32xf32>
    %cst_3 = arith.constant 6.250000e-02 : f32
    %8 = vector.broadcast %cst_3 : f32 to vector<1x32xf32>
    %9 = arith.mulf %5, %8 : vector<1x32xf32>
    %10 = arith.mulf %7, %7 : vector<1x32xf32>
    %11 = arith.subf %9, %10 : vector<1x32xf32>
    %cst_4 = arith.constant 0.000000e+00 : f32
    %12 = vector.broadcast %cst_4 : f32 to vector<1x32xf32>
    %13 = arith.maximumf %11, %12 : vector<1x32xf32>
    %cst_5 = arith.constant 9.99999974E-6 : f32
    %14 = vector.broadcast %cst_5 : f32 to vector<1x32xf32>
    %15 = arith.addf %13, %14 : vector<1x32xf32>
    %16 = math.rsqrt %15 : vector<1x32xf32>
    %c0_6 = arith.constant 0 : index
    %c0_7 = arith.constant 0 : index
    %17 = vector.load %arg1[%c0_6, %c0_7] : memref<1x32xf32, #tpu.memory_space<vmem>>, vector<1x32xf32>
    %18 = arith.mulf %16, %17 : vector<1x32xf32>
    %c0_8 = arith.constant 0 : index
    %c0_9 = arith.constant 0 : index
    %19 = vector.load %arg2[%c0_8, %c0_9] : memref<1x32xf32, #tpu.memory_space<vmem>>, vector<1x32xf32>
    %20 = arith.mulf %7, %18 : vector<1x32xf32>
    %21 = arith.subf %19, %20 : vector<1x32xf32>
    %22 = vector.broadcast %18 : vector<1x32xf32> to vector<16x32xf32>
    %23 = arith.mulf %0, %22 : vector<16x32xf32>
    %24 = vector.broadcast %21 : vector<1x32xf32> to vector<16x32xf32>
    %25 = arith.addf %23, %24 : vector<16x32xf32>
    %c0_10 = arith.constant 0 : index
    %c0_11 = arith.constant 0 : index
    %26 = vector.load %arg3[%c0_10, %c0_11] : memref<16x32xf32, #tpu.memory_space<vmem>>, vector<16x32xf32>
    tpu.vector_store %arg3[%c0_10, %c0_11], %25 {strides = array<i32>} : memref<16x32xf32, #tpu.memory_space<vmem>>, vector<16x32xf32>,
    return
  }
}

</mosaic_0001>

<bundles_post_ra>
// kernel: tpu_custom_call.1
= control target key start
LH: loop header
LB: loop body
LE: loop exit
PB: predicated region body
PF: predicated region fallthrough
CT: control target
= control target key end

     0   :  { %8 = vsyncpa [#allocation3], 0  ;;  %s253_s0 = inlined_call_operand.hbm [shape: f32[16,32], index: 0, kind: input, shape index: {}]   ;;  %s254_s1 = inlined_call_operand.hbm [shape: f32[1,32], index: 1, kind: input, shape index: {}]   ;;  %s255_s2 = inlined_call_operand.vmem [shape: f32[1,32], index: 2, kind: input, shape index: {}]   ;;  %s256_s3 = inlined_call_operand.hbm [shape: f32[16,32], index: 3, kind: output, shape index: {}]  }
   0x1   :  { %9 = vsyncpa [#allocation6], 0 }
   0x2   :  { %10 = vsyncpa [#allocation4], 0  ;;  %s15_s14 = sshll.u32 %s253_s0, 4  ;;  %s204_s15 = smov [#allocation2]   ;;  %s16_s14 = int_to_ptr.hbm [resolvable:$true] %s15_s14 }
   0x3   :  { %s17_s16 = sshll.u32 %s204_s15, 4  ;;  %s29_s19 = sshll.u32 %s254_s1, 4  ;;  %s18_s16 = int_to_ptr.vmem [resolvable:$true] %s17_s16  ;;  %s30_s19 = int_to_ptr.hbm [resolvable:$true] %s29_s19 }
   0x4   :  { %s205_s20 = smov 128   ;;  %s206_s21 = smov 8  }
   0x5   :  { %23 = dma.hbm_to_vmem [thread:$0]  %s16_s14, 256, %s18_s16, [#allocation3], %s205_s20, %s205_s20, %s206_s21  }
   0x6   :  { %s207_s22 = smov [#allocation5]  }
   0x7   :  { %s31_s23 = sshll.u32 %s207_s22, 4  ;;  %s32_s23 = int_to_ptr.vmem [resolvable:$true] %s31_s23 }
   0x8   :  { %34 = dma.hbm_to_vmem [thread:$0]  %s30_s19, 16, %s32_s23, [#allocation6]  }
   0x9   :  { %198 = dma.done.wait [#allocation3], 256  }
   0xa   :  { %199 = vsyncadd [#allocation3], 4294967040 }
   0xb   :  { %200 = dma.done.wait [#allocation6], 16  }
   0xc   :  { %201 = vsyncadd [#allocation6], 4294967280  ;;  %vm47_vm0 = vcmask 261120   ;;  %v45_v0 = vld [vmem:[#allocation2] sm:$0xff]  ;;  %v46_v1 = vld [vmem:[#allocation2 + $0x8] sm:$0xff]  ;;  %s208_s24 = smov [#allocation7]  }
   0xd   :  { %v48_v2 = vsel %vm47_vm0, %v45_v0, 0.0  ;;  %v49_v3 = vsel %vm47_vm0, %v46_v1, 0.0  ;;  %v57_v4 = vmul.f32 %v45_v0, %v45_v0  ;;  %v58_v5 = vmul.f32 %v46_v1, %v46_v1  ;;  %v84_v34 = vld [vmem:[#allocation5] sm:$0x1]  ;;  %v86_v37 = vld [vmem:[%s255_s2] sm:$0x1] }
   0xe   :  { %v50_v6 = vadd.f32 %v49_v3, %v48_v2  ;;  %s103_s25 = sshll.u32 %s208_s24, 4  ;;  %s105_s28 = sshll.u32 %s256_s3, 4  ;;  %s104_s25 = int_to_ptr.vmem [resolvable:$true] %s103_s25  ;;  %s106_s28 = int_to_ptr.hbm [resolvable:$true] %s105_s28 }
   0xf   :  { %v59_v7 = vsel %vm47_vm0, %v57_v4, 0.0  ;;  %v60_v8 = vsel %vm47_vm0, %v58_v5, 0.0 }
  0x10   :  { %v51_v9 = vrot.slane %v50_v6, 4  ;;  %v61_v10 = vadd.f32 %v60_v8, %v59_v7 }
  0x12   :  { %v52_v11 = vadd.f32 %v51_v9, %v50_v6  ;;  %v62_v12 = vrot.slane %v61_v10, 4 }
  0x14   :  { %v53_v13 = vrot.slane %v52_v11, 2  ;;  %v63_v14 = vadd.f32 %v62_v12, %v61_v10 }
  0x16   :  { %v54_v15 = vadd.f32 %v53_v13, %v52_v11  ;;  %v64_v16 = vrot.slane %v63_v14, 2 }
  0x18   :  { %v55_v17 = vrot.slane %v54_v15, 1  ;;  %v65_v18 = vadd.f32 %v64_v16, %v63_v14 }
  0x1a   :  { %v56_v19 = vadd.f32 %v55_v17, %v54_v15  ;;  %v66_v20 = vrot.slane %v65_v18, 1 }
  0x1c   :  { %v67_v21 = vadd.f32 %v66_v20, %v65_v18  ;;  %v68_v22 = vmul.f32 0.0625, %v56_v19 }
  0x1e   :  { %v69_v23 = vmul.f32 0.0625, %v67_v21  ;;  %v70_v24 = vmul.f32 %v68_v22, %v68_v22 }
  0x20   :  { %v71_v25 = vsub.f32 %v69_v23, %v70_v24 }
  0x22   :  { %v72_v26 = vmax.f32 %v71_v25, 0.0 }
  0x24   :  { %v73_v27 = vadd.f32 1e-05, %v72_v26 }
  0x26   :  { %124 = vrsqrt.f32 %v73_v27  ;;  %vm80_vm1 = vweird.f32 %v73_v27 }
  0x2c   :  { %v125_v28 = vpop.eup %124 }
  0x2d   :  { %v75_v29 = vmul.f32 %v125_v28, %v73_v27  ;;  %vm81_vm2 = vweird.f32 %v125_v28 }
  0x2e   :  { %vm82_vm3 = vmor %vm80_vm1, %vm81_vm2 }
  0x2f   :  { %v76_v30 = vmul.f32 %v125_v28, %v75_v29 }
  0x31   :  { %v77_v31 = vmul.f32 0.5, %v76_v30 }
  0x33   :  { %v78_v32 = vsub.f32 1.5, %v77_v31 }
  0x35   :  { %v79_v33 = vmul.f32 %v125_v28, %v78_v32 }
  0x37   :  { %v83_v35 = vsel %vm82_vm3, %v125_v28, %v79_v33 }
  0x38   :  { %v85_v36 = vmul.f32 %v84_v34, %v83_v35 }
  0x3a   :  { %v87_v38 = vmul.f32 %v85_v36, %v68_v22  ;;  %v89_v39 = vperm.slane %v85_v36, 0 }
  0x3c   :  { %v88_v40 = vsub.f32 %v86_v37, %v87_v38  ;;  %v90_v41 = vmul.f32 %v89_v39, %v45_v0  ;;  %v91_v42 = vmul.f32 %v89_v39, %v46_v1 }
  0x3e   :  { %v93_v43 = vperm.slane %v88_v40, 0 }
  0x40   :  { %v95_v44 = vadd.f32 %v93_v43, %v90_v41  ;;  %v96_v45 = vadd.f32 %v93_v43, %v91_v42 }
  0x42   :  { %97 = vst.msk [vmem:[#allocation7] sm:$0xff] %vm47_vm0, %v95_v44 }
  0x43   :  { %98 = vst.msk [vmem:[#allocation7 + $0x8] sm:$0xff] %vm47_vm0, %v96_v45 }
  0x44   :  { %111 = dma.vmem_to_hbm [thread:$0]  %s104_s25, 256, %s106_s28, [#allocation4], %s205_s20, %s205_s20, %s206_s21  }
  0x45   :  { %202 = dma.done.wait [#allocation4], 256  }
  0x46   :  { %203 = vsyncadd [#allocation4], 4294967040 }
  0x47   :  { %116 = vsyncpa [#allocation3], 1 }
  0x48   :  { %117 = vsyncpa [#allocation6], 1 }
  0x49   :  { %118 = vsyncpa [#allocation4], 1 }

</bundles_post_ra>
